<compile_context>
chip_gen: v6e
topology: v6e:2x2x1
jax: 0.10.0
libtpu: 0.0.40
codegen_flags: <defaults>
</compile_context>

<pallas_src>
import functools

import jax
import jax.numpy as jnp
from jax import lax
from jax.experimental import pallas as pl
from jax.experimental.pallas import tpu as pltpu

NEG_SLOPE = 0.01  # nn.LeakyReLU default negative_slope


def _leaky_relu(x):
    # max(x, a*x) == LeakyReLU(x) for 0 <= a < 1; cheaper than cmp+select.
    return jnp.maximum(x, NEG_SLOPE * x)


def _convblock_kernel(H, W, FRONT,
                      x_ref, mask_ref, w1cat_ref, b1_ref, b11_ref,
                      w2_ref, b2_ref, y_ref,
                      pad1_ref, pad2_ref, pat1_ref, pat2_ref):
    """Per-batch ConvBlock: (conv3x3+conv1x1 fused matmul) -> lrelu ->
    conv3x3 -> lrelu -> + residual."""
    HW = H * W
    x = x_ref[0]                                   # (Cin, HW) channels-major
    cin = x.shape[0]
    cout = y_ref.shape[1]

    # column-validity masks (0.0 where the dx=0 / dx=2 tap would wrap a row)
    not_left = mask_ref[0:1, :]                    # (1, HW)
    not_right = mask_ref[1:2, :]                   # (1, HW)

    def stage_padded(src, dst_ref, c):
        # rows-padded flat layout: element (y, x) of `src` lives at lane
        # FRONT + y*W + x.  The only lanes any tap reads outside the center
        # are the two (W+1)-wide halo strips -> zero just those, then do one
        # 128-lane-aligned center store.
        zeros = jnp.zeros((c, W + 1), jnp.float32)
        dst_ref[:, FRONT - (W + 1):FRONT] = zeros
        dst_ref[:, FRONT + HW:FRONT + HW + W + 1] = zeros
        dst_ref[:, FRONT:FRONT + HW] = src

    def im2col(src_ref, pat_ref, c):
        # tap (dy, dx) of the 3x3 stencil == a contiguous lane window of the
        # rows-padded flat buffer; only the column wrap (dx != 1) needs a mask.
        for dy in range(3):
            for dx in range(3):
                start = FRONT + (dy - 1) * W + (dx - 1)
                slab = src_ref[:, start:start + HW]            # (c, HW)
                if dx == 0:
                    slab = slab * not_left
                elif dx == 2:
                    slab = slab * not_right
                t = dy * 3 + dx
                pat_ref[t * c:(t + 1) * c, :] = slab

    # conv1 (3x3, pad=1) + conv11 (1x1) fused: one (2*Cout, 9*Cin) x
    # (9*Cin, HW) MXU matmul.  The 1x1 weights live only in the center-tap
    # columns of the lower row-block of w1cat.
    stage_padded(x, pad1_ref, cin)
    im2col(pad1_ref, pat1_ref, cin)
    res = jnp.dot(w1cat_ref[...], pat1_ref[...],
                  preferred_element_type=jnp.float32)          # (2*Cout, HW)
    o1 = _leaky_relu(res[:cout] + b1_ref[...])                 # conv1 branch
    o11 = res[cout:] + b11_ref[...]                            # residual 1x1

    # conv2: 3x3, padding=1 on o1 -> single (Cout, 9*Cout) x (9*Cout, HW)
    stage_padded(o1, pad2_ref, cout)
    im2col(pad2_ref, pat2_ref, cout)
    a2 = jnp.dot(w2_ref[...], pat2_ref[...],
                 preferred_element_type=jnp.float32) + b2_ref[...]

    # lane-dense (Cout, HW) output store
    y_ref[0] = _leaky_relu(a2) + o11


def convblock_forward(params, x):
    """ConvBlock forward. x: (B, Cin, H, W) NCHW -> (B, Cout, H, W) NCHW."""
    B, Cin, H, W = x.shape
    Cout = params["b1"].shape[0]
    HW = H * W
    FRONT = ((W + 1 + 127) // 128) * 128           # 128-aligned center offset
    PADLEN = FRONT + HW + W + 1

    # weights to matmul layout: (Cout, Cin, 3, 3) -> (Cout, 9*Cin), row order
    # (dy, dx, ci) matching the im2col patch-slab rows.
    w1m = jnp.transpose(params["w1"], (0, 2, 3, 1)).reshape(Cout, 9 * Cin)
    # embed the 1x1 conv into the center-tap (dy=1,dx=1 -> tap 4) columns of a
    # second row-block so conv1 and conv11 share a single MXU matmul.
    w11_rows = jnp.zeros((Cout, 9 * Cin), jnp.float32).at[
        :, 4 * Cin:5 * Cin].set(params["w11"].reshape(Cout, Cin))
    w1cat = jnp.concatenate([w1m, w11_rows], axis=0)           # (2*Cout, 9*Cin)
    w2m = jnp.transpose(params["w2"], (0, 2, 3, 1)).reshape(Cout, 9 * Cout)
    b1 = params["b1"].reshape(Cout, 1)
    b11 = params["b11"].reshape(Cout, 1)
    b2 = params["b2"].reshape(Cout, 1)

    xf = x.reshape(B, Cin, HW)                     # free reshape, stays NCHW

    # lane masks killing the row wrap-around of the dx=0 / dx=2 taps
    col = jnp.arange(HW, dtype=jnp.int32) % W
    mask = jnp.stack([col != 0, col != W - 1]).astype(jnp.float32)  # (2, HW)

    kernel = functools.partial(_convblock_kernel, H, W, FRONT)

    y = pl.pallas_call(
        kernel,
        out_shape=jax.ShapeDtypeStruct((B, Cout, HW), jnp.float32),
        grid=(B,),
        in_specs=[
            pl.BlockSpec((1, Cin, HW), lambda b: (b, 0, 0)),
            pl.BlockSpec((2, HW), lambda b: (0, 0)),
            pl.BlockSpec((2 * Cout, 9 * Cin), lambda b: (0, 0)),
            pl.BlockSpec((Cout, 1), lambda b: (0, 0)),
            pl.BlockSpec((Cout, 1), lambda b: (0, 0)),
            pl.BlockSpec((Cout, 9 * Cout), lambda b: (0, 0)),
            pl.BlockSpec((Cout, 1), lambda b: (0, 0)),
        ],
        out_specs=pl.BlockSpec((1, Cout, HW), lambda b: (b, 0, 0)),
        scratch_shapes=[
            pltpu.VMEM((Cin, PADLEN), jnp.float32),     # padded-flat x
            pltpu.VMEM((Cout, PADLEN), jnp.float32),    # padded-flat o1
            pltpu.VMEM((9 * Cin, HW), jnp.float32),     # im2col slab, conv1
            pltpu.VMEM((9 * Cout, HW), jnp.float32),    # im2col slab, conv2
        ],
        compiler_params=pltpu.CompilerParams(
            dimension_semantics=("parallel",)),         # v7x megacore on batch
    )(xf, mask, w1cat, b1, b11, w2m, b2)

    return y.reshape(B, Cout, H, W)


def init_params(key, in_channel, out_channel):
    """Deterministic init mirroring nn.Conv2d shapes (PyTorch OIHW layout)."""
    keys = jax.random.split(key, 6)

    def uni(k, shape, fan_in):
        bound = 1.0 / jnp.sqrt(jnp.float32(fan_in))
        return jax.random.uniform(k, shape, jnp.float32, -bound, bound)

    return dict(
        w1=uni(keys[0], (out_channel, in_channel, 3, 3), 9 * in_channel),
        b1=uni(keys[1], (out_channel,), 9 * in_channel),
        w2=uni(keys[2], (out_channel, out_channel, 3, 3), 9 * out_channel),
        b2=uni(keys[3], (out_channel,), 9 * out_channel),
        w11=uni(keys[4], (out_channel, in_channel, 1, 1), in_channel),
        b11=uni(keys[5], (out_channel,), in_channel),
    )


def _reference(params, x):
    """Pure-JAX ConvBlock reference (XLA convs), for a sanity check."""
    dn = ("NCHW", "OIHW", "NCHW")

    def conv(h, w, b, pad):
        y = lax.conv_general_dilated(h, w, (1, 1), pad, dimension_numbers=dn,
                                     precision=lax.Precision.HIGHEST)
        return y + b.reshape(1, -1, 1, 1)

    def lrelu(v):
        return jnp.where(v > 0, v, NEG_SLOPE * v)

    o = lrelu(conv(x, params["w1"], params["b1"], ((1, 1), (1, 1))))
    o = lrelu(conv(o, params["w2"], params["b2"], ((1, 1), (1, 1))))
    return o + conv(x, params["w11"], params["b11"], ((0, 0), (0, 0)))


if __name__ == "__main__":
    key = jax.random.PRNGKey(0)
    kx, kp = jax.random.split(key)

    B, Cin, Cout, H, W = 2, 4, 16, 16, 16
    x = jax.random.normal(kx, (B, Cin, H, W), jnp.float32)
    params = init_params(kp, Cin, Cout)

    out = jax.jit(convblock_forward)(params, x)
    jax.block_until_ready(out)

    assert out.shape == (B, Cout, H, W)
    assert bool(jnp.all(jnp.isfinite(out)))
    err = float(jnp.max(jnp.abs(out - _reference(params, x))))
    assert err < 5e-2, f"max abs error vs reference: {err}"
    print("KERNEL_OK")
</pallas_src>

<mosaic_0001>
module attributes {stable_mosaic.version = 11 : i64} {
  func.func @_convblock_kernel(%arg0: i32, %arg1: memref<1x4x256xf32, #tpu.memory_space<vmem>>, %arg2: memref<2x256xf32, #tpu.memory_space<vmem>>, %arg3: memref<32x36xf32, #tpu.memory_space<vmem>>, %arg4: memref<16x1xf32, #tpu.memory_space<vmem>>, %arg5: memref<16x1xf32, #tpu.memory_space<vmem>>, %arg6: memref<16x144xf32, #tpu.memory_space<vmem>>, %arg7: memref<16x1xf32, #tpu.memory_space<vmem>>, %arg8: memref<1x16x256xf32, #tpu.memory_space<vmem>>, %arg9: memref<4x401xf32, #tpu.memory_space<vmem>>, %arg10: memref<16x401xf32, #tpu.memory_space<vmem>>, %arg11: memref<36x256xf32, #tpu.memory_space<vmem>>, %arg12: memref<144x256xf32, #tpu.memory_space<vmem>>) attributes {dimension_semantics = [#tpu.dimension_semantics<parallel>], iteration_bounds = array<i64: 2>, scalar_prefetch = 0 : i64, scratch_operands = 4 : i64, tpu.core_type = #tpu.core_type<tc>, window_params = [{transform_indices = @transform_0, window_bounds = array<i64: 1, 4, 256>}, {pipeline_mode = #tpu.pipeline_mode<synchronous>, transform_indices = @transform_1, window_bounds = array<i64: 2, 256>}, {pipeline_mode = #tpu.pipeline_mode<synchronous>, transform_indices = @transform_2, window_bounds = array<i64: 32, 36>}, {pipeline_mode = #tpu.pipeline_mode<synchronous>, transform_indices = @transform_3, window_bounds = array<i64: 16, 1>}, {pipeline_mode = #tpu.pipeline_mode<synchronous>, transform_indices = @transform_4, window_bounds = array<i64: 16, 1>}, {pipeline_mode = #tpu.pipeline_mode<synchronous>, transform_indices = @transform_5, window_bounds = array<i64: 16, 144>}, {pipeline_mode = #tpu.pipeline_mode<synchronous>, transform_indices = @transform_6, window_bounds = array<i64: 16, 1>}, {transform_indices = @transform_7, window_bounds = array<i64: 1, 16, 256>}]} {
    %c0 = arith.constant 0 : index
    %c0_0 = arith.constant 0 : index
    %c0_1 = arith.constant 0 : index
    %0 = vector.load %arg1[%c0, %c0_0, %c0_1] : memref<1x4x256xf32, #tpu.memory_space<vmem>>, vector<1x4x256xf32>
    %1 = vector.shape_cast %0 : vector<1x4x256xf32> to vector<4x256xf32>
    %c0_2 = arith.constant 0 : index
    %c0_3 = arith.constant 0 : index
    %2 = vector.load %arg2[%c0_2, %c0_3] : memref<2x256xf32, #tpu.memory_space<vmem>>, vector<1x256xf32>
    %c1 = arith.constant 1 : index
    %c0_4 = arith.constant 0 : index
    %3 = vector.load %arg2[%c1, %c0_4] : memref<2x256xf32, #tpu.memory_space<vmem>>, vector<1x256xf32>
    %cst = arith.constant 0.000000e+00 : f32
    %4 = vector.broadcast %cst : f32 to vector<4x17xf32>
    %c0_5 = arith.constant 0 : index
    %c111 = arith.constant 111 : index
    %5 = vector.load %arg9[%c0_5, %c111] : memref<4x401xf32, #tpu.memory_space<vmem>>, vector<4x17xf32>
    tpu.vector_store %arg9[%c0_5, %c111], %4 {strides = array<i32>} : memref<4x401xf32, #tpu.memory_space<vmem>>, vector<4x17xf32>,
    %c0_6 = arith.constant 0 : index
    %c384 = arith.constant 384 : index
    %6 = vector.load %arg9[%c0_6, %c384] : memref<4x401xf32, #tpu.memory_space<vmem>>, vector<4x17xf32>
    tpu.vector_store %arg9[%c0_6, %c384], %4 {strides = array<i32>} : memref<4x401xf32, #tpu.memory_space<vmem>>, vector<4x17xf32>,
    %c0_7 = arith.constant 0 : index
    %c128 = arith.constant 128 : index
    %7 = vector.load %arg9[%c0_7, %c128] : memref<4x401xf32, #tpu.memory_space<vmem>>, vector<4x256xf32>
    tpu.vector_store %arg9[%c0_7, %c128], %1 {strides = array<i32>} : memref<4x401xf32, #tpu.memory_space<vmem>>, vector<4x256xf32>,
    %c0_8 = arith.constant 0 : index
    %c111_9 = arith.constant 111 : index
    %8 = vector.load %arg9[%c0_8, %c111_9] : memref<4x401xf32, #tpu.memory_space<vmem>>, vector<4x256xf32>
    %9 = vector.broadcast %2 : vector<1x256xf32> to vector<4x256xf32>
    %10 = arith.mulf %8, %9 : vector<4x256xf32>
    %c0_10 = arith.constant 0 : index
    %c0_11 = arith.constant 0 : index
    %11 = vector.load %arg11[%c0_10, %c0_11] : memref<36x256xf32, #tpu.memory_space<vmem>>, vector<4x256xf32>
    tpu.vector_store %arg11[%c0_10, %c0_11], %10 {strides = array<i32>} : memref<36x256xf32, #tpu.memory_space<vmem>>, vector<4x256xf32>,
    %c0_12 = arith.constant 0 : index
    %c112 = arith.constant 112 : index
    %12 = vector.load %arg9[%c0_12, %c112] : memref<4x401xf32, #tpu.memory_space<vmem>>, vector<4x256xf32>
    %c4 = arith.constant 4 : index
    %c0_13 = arith.constant 0 : index
    %13 = vector.load %arg11[%c4, %c0_13] : memref<36x256xf32, #tpu.memory_space<vmem>>, vector<4x256xf32>
    tpu.vector_store %arg11[%c4, %c0_13], %12 {strides = array<i32>} : memref<36x256xf32, #tpu.memory_space<vmem>>, vector<4x256xf32>,
    %c0_14 = arith.constant 0 : index
    %c113 = arith.constant 113 : index
    %14 = vector.load %arg9[%c0_14, %c113] : memref<4x401xf32, #tpu.memory_space<vmem>>, vector<4x256xf32>
    %15 = vector.broadcast %3 : vector<1x256xf32> to vector<4x256xf32>
    %16 = arith.mulf %14, %15 : vector<4x256xf32>
    %c8 = arith.constant 8 : index
    %c0_15 = arith.constant 0 : index
    %17 = vector.load %arg11[%c8, %c0_15] : memref<36x256xf32, #tpu.memory_space<vmem>>, vector<4x256xf32>
    tpu.vector_store %arg11[%c8, %c0_15], %16 {strides = array<i32>} : memref<36x256xf32, #tpu.memory_space<vmem>>, vector<4x256xf32>,
    %c0_16 = arith.constant 0 : index
    %c127 = arith.constant 127 : index
    %18 = vector.load %arg9[%c0_16, %c127] : memref<4x401xf32, #tpu.memory_space<vmem>>, vector<4x256xf32>
    %19 = vector.broadcast %2 : vector<1x256xf32> to vector<4x256xf32>
    %20 = arith.mulf %18, %19 : vector<4x256xf32>
    %c12 = arith.constant 12 : index
    %c0_17 = arith.constant 0 : index
    %21 = vector.load %arg11[%c12, %c0_17] : memref<36x256xf32, #tpu.memory_space<vmem>>, vector<4x256xf32>
    tpu.vector_store %arg11[%c12, %c0_17], %20 {strides = array<i32>} : memref<36x256xf32, #tpu.memory_space<vmem>>, vector<4x256xf32>,
    %c0_18 = arith.constant 0 : index
    %c128_19 = arith.constant 128 : index
    %22 = vector.load %arg9[%c0_18, %c128_19] : memref<4x401xf32, #tpu.memory_space<vmem>>, vector<4x256xf32>
    %c16 = arith.constant 16 : index
    %c0_20 = arith.constant 0 : index
    %23 = vector.load %arg11[%c16, %c0_20] : memref<36x256xf32, #tpu.memory_space<vmem>>, vector<4x256xf32>
    tpu.vector_store %arg11[%c16, %c0_20], %22 {strides = array<i32>} : memref<36x256xf32, #tpu.memory_space<vmem>>, vector<4x256xf32>,
    %c0_21 = arith.constant 0 : index
    %c129 = arith.constant 129 : index
    %24 = vector.load %arg9[%c0_21, %c129] : memref<4x401xf32, #tpu.memory_space<vmem>>, vector<4x256xf32>
    %25 = vector.broadcast %3 : vector<1x256xf32> to vector<4x256xf32>
    %26 = arith.mulf %24, %25 : vector<4x256xf32>
    %c20 = arith.constant 20 : index
    %c0_22 = arith.constant 0 : index
    %27 = vector.load %arg11[%c20, %c0_22] : memref<36x256xf32, #tpu.memory_space<vmem>>, vector<4x256xf32>
    tpu.vector_store %arg11[%c20, %c0_22], %26 {strides = array<i32>} : memref<36x256xf32, #tpu.memory_space<vmem>>, vector<4x256xf32>,
    %c0_23 = arith.constant 0 : index
    %c143 = arith.constant 143 : index
    %28 = vector.load %arg9[%c0_23, %c143] : memref<4x401xf32, #tpu.memory_space<vmem>>, vector<4x256xf32>
    %29 = vector.broadcast %2 : vector<1x256xf32> to vector<4x256xf32>
    %30 = arith.mulf %28, %29 : vector<4x256xf32>
    %c24 = arith.constant 24 : index
    %c0_24 = arith.constant 0 : index
    %31 = vector.load %arg11[%c24, %c0_24] : memref<36x256xf32, #tpu.memory_space<vmem>>, vector<4x256xf32>
    tpu.vector_store %arg11[%c24, %c0_24], %30 {strides = array<i32>} : memref<36x256xf32, #tpu.memory_space<vmem>>, vector<4x256xf32>,
    %c0_25 = arith.constant 0 : index
    %c144 = arith.constant 144 : index
    %32 = vector.load %arg9[%c0_25, %c144] : memref<4x401xf32, #tpu.memory_space<vmem>>, vector<4x256xf32>
    %c28 = arith.constant 28 : index
    %c0_26 = arith.constant 0 : index
    %33 = vector.load %arg11[%c28, %c0_26] : memref<36x256xf32, #tpu.memory_space<vmem>>, vector<4x256xf32>
    tpu.vector_store %arg11[%c28, %c0_26], %32 {strides = array<i32>} : memref<36x256xf32, #tpu.memory_space<vmem>>, vector<4x256xf32>,
    %c0_27 = arith.constant 0 : index
    %c145 = arith.constant 145 : index
    %34 = vector.load %arg9[%c0_27, %c145] : memref<4x401xf32, #tpu.memory_space<vmem>>, vector<4x256xf32>
    %35 = vector.broadcast %3 : vector<1x256xf32> to vector<4x256xf32>
    %36 = arith.mulf %34, %35 : vector<4x256xf32>
    %c32 = arith.constant 32 : index
    %c0_28 = arith.constant 0 : index
    %37 = vector.load %arg11[%c32, %c0_28] : memref<36x256xf32, #tpu.memory_space<vmem>>, vector<4x256xf32>
    tpu.vector_store %arg11[%c32, %c0_28], %36 {strides = array<i32>} : memref<36x256xf32, #tpu.memory_space<vmem>>, vector<4x256xf32>,
    %c0_29 = arith.constant 0 : index
    %c0_30 = arith.constant 0 : index
    %38 = vector.load %arg3[%c0_29, %c0_30] : memref<32x36xf32, #tpu.memory_space<vmem>>, vector<32x36xf32>
    %c0_31 = arith.constant 0 : index
    %c0_32 = arith.constant 0 : index
    %39 = vector.load %arg11[%c0_31, %c0_32] : memref<36x256xf32, #tpu.memory_space<vmem>>, vector<36x256xf32>
    %cst_33 = arith.constant dense<0.000000e+00> : vector<32x256xf32>
    %40 = tpu.matmul %38, %39, %cst_33 {dimension_numbers = #tpu.dot_dimension_numbers<[1], [0], [0], [1], [0, 0, 1, 1], [], []>} : vector<32x36xf32>, vector<36x256xf32>, vector<32x256xf32> -> vector<32x256xf32>
    %41 = vector.extract_strided_slice %40 {offsets = [0, 0], sizes = [16, 256], strides = [1, 1]} : vector<32x256xf32> to vector<16x256xf32>
    %c0_34 = arith.constant 0 : index
    %c0_35 = arith.constant 0 : index
    %42 = vector.load %arg4[%c0_34, %c0_35] : memref<16x1xf32, #tpu.memory_space<vmem>>, vector<16x1xf32>
    %43 = vector.broadcast %42 : vector<16x1xf32> to vector<16x256xf32>
    %44 = arith.addf %41, %43 : vector<16x256xf32>
    %cst_36 = arith.constant 0.00999999977 : f32
    %45 = vector.broadcast %cst_36 : f32 to vector<16x256xf32>
    %46 = arith.mulf %45, %44 : vector<16x256xf32>
    %47 = arith.maximumf %44, %46 : vector<16x256xf32>
    %48 = vector.extract_strided_slice %40 {offsets = [16, 0], sizes = [16, 256], strides = [1, 1]} : vector<32x256xf32> to vector<16x256xf32>
    %c0_37 = arith.constant 0 : index
    %c0_38 = arith.constant 0 : index
    %49 = vector.load %arg5[%c0_37, %c0_38] : memref<16x1xf32, #tpu.memory_space<vmem>>, vector<16x1xf32>
    %50 = vector.broadcast %49 : vector<16x1xf32> to vector<16x256xf32>
    %51 = arith.addf %48, %50 : vector<16x256xf32>
    %cst_39 = arith.constant 0.000000e+00 : f32
    %52 = vector.broadcast %cst_39 : f32 to vector<16x17xf32>
    %c0_40 = arith.constant 0 : index
    %c111_41 = arith.constant 111 : index
    %53 = vector.load %arg10[%c0_40, %c111_41] : memref<16x401xf32, #tpu.memory_space<vmem>>, vector<16x17xf32>
    tpu.vector_store %arg10[%c0_40, %c111_41], %52 {strides = array<i32>} : memref<16x401xf32, #tpu.memory_space<vmem>>, vector<16x17xf32>,
    %c0_42 = arith.constant 0 : index
    %c384_43 = arith.constant 384 : index
    %54 = vector.load %arg10[%c0_42, %c384_43] : memref<16x401xf32, #tpu.memory_space<vmem>>, vector<16x17xf32>
    tpu.vector_store %arg10[%c0_42, %c384_43], %52 {strides = array<i32>} : memref<16x401xf32, #tpu.memory_space<vmem>>, vector<16x17xf32>,
    %c0_44 = arith.constant 0 : index
    %c128_45 = arith.constant 128 : index
    %55 = vector.load %arg10[%c0_44, %c128_45] : memref<16x401xf32, #tpu.memory_space<vmem>>, vector<16x256xf32>
    tpu.vector_store %arg10[%c0_44, %c128_45], %47 {strides = array<i32>} : memref<16x401xf32, #tpu.memory_space<vmem>>, vector<16x256xf32>,
    %c0_46 = arith.constant 0 : index
    %c111_47 = arith.constant 111 : index
    %56 = vector.load %arg10[%c0_46, %c111_47] : memref<16x401xf32, #tpu.memory_space<vmem>>, vector<16x256xf32>
    %57 = vector.broadcast %2 : vector<1x256xf32> to vector<16x256xf32>
    %58 = arith.mulf %56, %57 : vector<16x256xf32>
    %c0_48 = arith.constant 0 : index
    %c0_49 = arith.constant 0 : index
    %59 = vector.load %arg12[%c0_48, %c0_49] : memref<144x256xf32, #tpu.memory_space<vmem>>, vector<16x256xf32>
    tpu.vector_store %arg12[%c0_48, %c0_49], %58 {strides = array<i32>} : memref<144x256xf32, #tpu.memory_space<vmem>>, vector<16x256xf32>,
    %c0_50 = arith.constant 0 : index
    %c112_51 = arith.constant 112 : index
    %60 = vector.load %arg10[%c0_50, %c112_51] : memref<16x401xf32, #tpu.memory_space<vmem>>, vector<16x256xf32>
    %c16_52 = arith.constant 16 : index
    %c0_53 = arith.constant 0 : index
    %61 = vector.load %arg12[%c16_52, %c0_53] : memref<144x256xf32, #tpu.memory_space<vmem>>, vector<16x256xf32>
    tpu.vector_store %arg12[%c16_52, %c0_53], %60 {strides = array<i32>} : memref<144x256xf32, #tpu.memory_space<vmem>>, vector<16x256xf32>,
    %c0_54 = arith.constant 0 : index
    %c113_55 = arith.constant 113 : index
    %62 = vector.load %arg10[%c0_54, %c113_55] : memref<16x401xf32, #tpu.memory_space<vmem>>, vector<16x256xf32>
    %63 = vector.broadcast %3 : vector<1x256xf32> to vector<16x256xf32>
    %64 = arith.mulf %62, %63 : vector<16x256xf32>
    %c32_56 = arith.constant 32 : index
    %c0_57 = arith.constant 0 : index
    %65 = vector.load %arg12[%c32_56, %c0_57] : memref<144x256xf32, #tpu.memory_space<vmem>>, vector<16x256xf32>
    tpu.vector_store %arg12[%c32_56, %c0_57], %64 {strides = array<i32>} : memref<144x256xf32, #tpu.memory_space<vmem>>, vector<16x256xf32>,
    %c0_58 = arith.constant 0 : index
    %c127_59 = arith.constant 127 : index
    %66 = vector.load %arg10[%c0_58, %c127_59] : memref<16x401xf32, #tpu.memory_space<vmem>>, vector<16x256xf32>
    %67 = vector.broadcast %2 : vector<1x256xf32> to vector<16x256xf32>
    %68 = arith.mulf %66, %67 : vector<16x256xf32>
    %c48 = arith.constant 48 : index
    %c0_60 = arith.constant 0 : index
    %69 = vector.load %arg12[%c48, %c0_60] : memref<144x256xf32, #tpu.memory_space<vmem>>, vector<16x256xf32>
    tpu.vector_store %arg12[%c48, %c0_60], %68 {strides = array<i32>} : memref<144x256xf32, #tpu.memory_space<vmem>>, vector<16x256xf32>,
    %c0_61 = arith.constant 0 : index
    %c128_62 = arith.constant 128 : index
    %70 = vector.load %arg10[%c0_61, %c128_62] : memref<16x401xf32, #tpu.memory_space<vmem>>, vector<16x256xf32>
    %c64 = arith.constant 64 : index
    %c0_63 = arith.constant 0 : index
    %71 = vector.load %arg12[%c64, %c0_63] : memref<144x256xf32, #tpu.memory_space<vmem>>, vector<16x256xf32>
    tpu.vector_store %arg12[%c64, %c0_63], %70 {strides = array<i32>} : memref<144x256xf32, #tpu.memory_space<vmem>>, vector<16x256xf32>,
    %c0_64 = arith.constant 0 : index
    %c129_65 = arith.constant 129 : index
    %72 = vector.load %arg10[%c0_64, %c129_65] : memref<16x401xf32, #tpu.memory_space<vmem>>, vector<16x256xf32>
    %73 = vector.broadcast %3 : vector<1x256xf32> to vector<16x256xf32>
    %74 = arith.mulf %72, %73 : vector<16x256xf32>
    %c80 = arith.constant 80 : index
    %c0_66 = arith.constant 0 : index
    %75 = vector.load %arg12[%c80, %c0_66] : memref<144x256xf32, #tpu.memory_space<vmem>>, vector<16x256xf32>
    tpu.vector_store %arg12[%c80, %c0_66], %74 {strides = array<i32>} : memref<144x256xf32, #tpu.memory_space<vmem>>, vector<16x256xf32>,
    %c0_67 = arith.constant 0 : index
    %c143_68 = arith.constant 143 : index
    %76 = vector.load %arg10[%c0_67, %c143_68] : memref<16x401xf32, #tpu.memory_space<vmem>>, vector<16x256xf32>
    %77 = vector.broadcast %2 : vector<1x256xf32> to vector<16x256xf32>
    %78 = arith.mulf %76, %77 : vector<16x256xf32>
    %c96 = arith.constant 96 : index
    %c0_69 = arith.constant 0 : index
    %79 = vector.load %arg12[%c96, %c0_69] : memref<144x256xf32, #tpu.memory_space<vmem>>, vector<16x256xf32>
    tpu.vector_store %arg12[%c96, %c0_69], %78 {strides = array<i32>} : memref<144x256xf32, #tpu.memory_space<vmem>>, vector<16x256xf32>,
    %c0_70 = arith.constant 0 : index
    %c144_71 = arith.constant 144 : index
    %80 = vector.load %arg10[%c0_70, %c144_71] : memref<16x401xf32, #tpu.memory_space<vmem>>, vector<16x256xf32>
    %c112_72 = arith.constant 112 : index
    %c0_73 = arith.constant 0 : index
    %81 = vector.load %arg12[%c112_72, %c0_73] : memref<144x256xf32, #tpu.memory_space<vmem>>, vector<16x256xf32>
    tpu.vector_store %arg12[%c112_72, %c0_73], %80 {strides = array<i32>} : memref<144x256xf32, #tpu.memory_space<vmem>>, vector<16x256xf32>,
    %c0_74 = arith.constant 0 : index
    %c145_75 = arith.constant 145 : index
    %82 = vector.load %arg10[%c0_74, %c145_75] : memref<16x401xf32, #tpu.memory_space<vmem>>, vector<16x256xf32>
    %83 = vector.broadcast %3 : vector<1x256xf32> to vector<16x256xf32>
    %84 = arith.mulf %82, %83 : vector<16x256xf32>
    %c128_76 = arith.constant 128 : index
    %c0_77 = arith.constant 0 : index
    %85 = vector.load %arg12[%c128_76, %c0_77] : memref<144x256xf32, #tpu.memory_space<vmem>>, vector<16x256xf32>
    tpu.vector_store %arg12[%c128_76, %c0_77], %84 {strides = array<i32>} : memref<144x256xf32, #tpu.memory_space<vmem>>, vector<16x256xf32>,
    %c0_78 = arith.constant 0 : index
    %c0_79 = arith.constant 0 : index
    %86 = vector.load %arg6[%c0_78, %c0_79] : memref<16x144xf32, #tpu.memory_space<vmem>>, vector<16x144xf32>
    %c0_80 = arith.constant 0 : index
    %c0_81 = arith.constant 0 : index
    %87 = vector.load %arg12[%c0_80, %c0_81] : memref<144x256xf32, #tpu.memory_space<vmem>>, vector<144x256xf32>
    %cst_82 = arith.constant dense<0.000000e+00> : vector<16x256xf32>
    %88 = tpu.matmul %86, %87, %cst_82 {dimension_numbers = #tpu.dot_dimension_numbers<[1], [0], [0], [1], [0, 0, 1, 1], [], []>} : vector<16x144xf32>, vector<144x256xf32>, vector<16x256xf32> -> vector<16x256xf32>
    %c0_83 = arith.constant 0 : index
    %c0_84 = arith.constant 0 : index
    %89 = vector.load %arg7[%c0_83, %c0_84] : memref<16x1xf32, #tpu.memory_space<vmem>>, vector<16x1xf32>
    %90 = vector.broadcast %89 : vector<16x1xf32> to vector<16x256xf32>
    %91 = arith.addf %88, %90 : vector<16x256xf32>
    %cst_85 = arith.constant 0.00999999977 : f32
    %92 = vector.broadcast %cst_85 : f32 to vector<16x256xf32>
    %93 = arith.mulf %92, %91 : vector<16x256xf32>
    %94 = arith.maximumf %91, %93 : vector<16x256xf32>
    %95 = arith.addf %94, %51 : vector<16x256xf32>
    %c0_86 = arith.constant 0 : index
    %c0_87 = arith.constant 0 : index
    %c0_88 = arith.constant 0 : index
    %96 = vector.load %arg8[%c0_86, %c0_87, %c0_88] : memref<1x16x256xf32, #tpu.memory_space<vmem>>, vector<1x16x256xf32>
    %97 = vector.shape_cast %96 : vector<1x16x256xf32> to vector<16x256xf32>
    %98 = vector.shape_cast %95 : vector<16x256xf32> to vector<1x16x256xf32>
    tpu.vector_store %arg8[%c0_86, %c0_87, %c0_88], %98 {strides = array<i32>} : memref<1x16x256xf32, #tpu.memory_space<vmem>>, vector<1x16x256xf32>,
    return
  }
  func.func @transform_0(%arg0: i32) -> (i32, i32, i32) {
    %c0_i32 = arith.constant 0 : i32
    %c0_i32_0 = arith.constant 0 : i32
    %c0_i32_1 = arith.constant 0 : i32
    return %arg0, %c0_i32, %c0_i32_0 : i32, i32, i32
  }
  func.func @transform_1(%arg0: i32) -> (i32, i32) {
    %c0_i32 = arith.constant 0 : i32
    %c0_i32_0 = arith.constant 0 : i32
    %c0_i32_1 = arith.constant 0 : i32
    return %c0_i32, %c0_i32_0 : i32, i32
  }
  func.func @transform_2(%arg0: i32) -> (i32, i32) {
    %c0_i32 = arith.constant 0 : i32
    %c0_i32_0 = arith.constant 0 : i32
    %c0_i32_1 = arith.constant 0 : i32
    return %c0_i32, %c0_i32_0 : i32, i32
  }
  func.func @transform_3(%arg0: i32) -> (i32, i32) {
    %c0_i32 = arith.constant 0 : i32
    %c0_i32_0 = arith.constant 0 : i32
    %c0_i32_1 = arith.constant 0 : i32
    return %c0_i32, %c0_i32_0 : i32, i32
  }
  func.func @transform_4(%arg0: i32) -> (i32, i32) {
    %c0_i32 = arith.constant 0 : i32
    %c0_i32_0 = arith.constant 0 : i32
    %c0_i32_1 = arith.constant 0 : i32
    return %c0_i32, %c0_i32_0 : i32, i32
  }
  func.func @transform_5(%arg0: i32) -> (i32, i32) {
    %c0_i32 = arith.constant 0 : i32
    %c0_i32_0 = arith.constant 0 : i32
    %c0_i32_1 = arith.constant 0 : i32
    return %c0_i32, %c0_i32_0 : i32, i32
  }
  func.func @transform_6(%arg0: i32) -> (i32, i32) {
    %c0_i32 = arith.constant 0 : i32
    %c0_i32_0 = arith.constant 0 : i32
    %c0_i32_1 = arith.constant 0 : i32
    return %c0_i32, %c0_i32_0 : i32, i32
  }
  func.func @transform_7(%arg0: i32) -> (i32, i32, i32) {
    %c0_i32 = arith.constant 0 : i32
    %c0_i32_0 = arith.constant 0 : i32
    %c0_i32_1 = arith.constant 0 : i32
    return %arg0, %c0_i32, %c0_i32_0 : i32, i32, i32
  }
}

</mosaic_0001>

<bundles_post_ra>
// kernel: convblock_forward.1
= control target key start
LH: loop header
LB: loop body
LE: loop exit
PB: predicated region body
PF: predicated region fallthrough
CT: control target
= control target key end

     0   :  { %s1372_s24 = smov 0   ;;  %s1771_s0 = inlined_call_operand.vmem [shape: f32[2,4,256], index: 0, kind: input, shape index: {}]   ;;  %s1772_s1 = inlined_call_operand.vmem [shape: f32[2,256], index: 1, kind: input, shape index: {}]   ;;  %s1773_s2 = inlined_call_operand.vmem [shape: f32[32,36], index: 2, kind: input, shape index: {}]   ;;  %s1774_s3 = inlined_call_operand.vmem [shape: f32[16,1], index: 3, kind: input, shape index: {}]   ;;  %s1775_s4 = inlined_call_operand.vmem [shape: f32[16,1], index: 4, kind: input, shape index: {}]   ;;  %s1776_s5 = inlined_call_operand.vmem [shape: f32[16,144], index: 5, kind: input, shape index: {}]   ;;  %s1777_s6 = inlined_call_operand.vmem [shape: f32[16,1], index: 6, kind: input, shape index: {}]   ;;  %s1778_s7 = inlined_call_operand.vmem [shape: f32[2,16,256], index: 7, kind: output, shape index: {}]  }
   0x1 LB: > { %s1268_s25 = sadd.s32 4294967295, %s1320_s24   ;;  %p1272_p0 = scmp.ge.s32.totalorder %s1320_s24, 1  ;;  %s1320_s24 = sphi %s1372_s24, %s17_s24  }
   0x2   : > { %p237_p1 = scmp.lt.s32.totalorder %s1320_s24, 3 }
   0x4   : > { %p238_p2 = pnand %p1272_p0, %p237_p1 }
   0x5   : > { %p269_p3 = scmp.lt.s32.totalorder (!%p238_p2), %s1268_s25, 1  ;;  %s1323_s11 = smov (!%p238_p2), 1  }
   0x6   : > { %241 = sbr.rel (%p238_p2) target bundleno = 898 (0x382), region = 48  ;;  %s1324_s12 = smov (!%p238_p2), 17  }
   0x7   : > { %s1325_s13 = smov (!%p238_p2), 113   ;;  %s1326_s14 = smov (!%p238_p2), 15  }
   0x8   : > { %s1327_s15 = smov (!%p238_p2), 111   ;;  %s1328_s16 = smov (!%p238_p2), 127  }
   0x9   : > { %s1329_s17 = smov (!%p238_p2), 112   ;;  %s1330_s18 = smov (!%p238_p2), 16  }
   0xb   : > { %v291_v0 = vlaneseq  ;;  %vm285_vm0 = vcmask 134144   ;;  %v1322_v1 = vmov 0.0   ;;  %v1277_v2 = vld [vmem:[%s1772_s1 + $0x1] ss:$2 sm:$0x3]  ;;  %vm318_vm1 = vcmask 138240  }
   0xc   : > { %608 = vmatprep.mubr.f32.mxu0 %v1322_v1  ;;  %286 = vst.msk [vmem:[#allocation2 + $0xc] sm:$0xf] %vm285_vm0, %v1322_v1  ;;  %vm283_vm2 = vcmask 1044344   ;;  %v280_v4 = vld [vmem:[%s1772_s1] ss:$2 sm:$0x3] }
   0xd   : > { %v292_v3 = vshrl.u32 %v291_v0, 7  ;;  %676 = vst.msk [vmem:[#allocation3 + $0x18] sm:$0xff] %vm318_vm1, %v1322_v1  ;;  %677 = vst.msk [vmem:[#allocation3 + $0x38] sm:$0xff] %vm318_vm1, %v1322_v1  ;;  %s1780_s25 = smov (!%p269_p3, %s1268_s25), 1  ;;  %vm374_vm3 = vcmask 121856   ;;  %vm386_vm4 = vcmask 1039360  }
   0xe   : > { %284 = vst.msk [vmem:[#allocation2] sm:$0xf] %vm283_vm2, %v1322_v1  ;;  %s1288_s30 = sshll.u32 %s1780_s25, 3  ;;  %vm478_vm5 = vcmask 916480   ;;  %vm402_vm6 = vcmask 7168   ;;  %vm359_vm7 = vcmask 924672  }
   0xf   : > { %v293_v5 = vsub.s32 0, %v292_v3  ;;  %v297_v6 = vsub.s32 1, %v292_v3  ;;  %s273_s10 = scalar_lea.vmem %s1771_s0, %s1288_s30  ;;  %vm337_vm8 = vcmask 130048   ;;  %vm303_vm9 = vcmask 908288   ;;  %s1289_s28 = sshll.u32 %s1780_s25, 5 }
  0x10   : > { %v1409_v12 = vld [vmem:[%s273_s10] sm:$0xff]  ;;  %vm537_vm10 = vcmask 1043456   ;;  %vm524_vm11 = vcmask 293888   ;;  %vm673_vm12 = vcmask 1048440   ;;  %s278_s8 = scalar_lea.vmem %s1778_s7, %s1289_s28 }
  0x11   : > { %v1395_v7 = vrot.slane %v1277_v2, %v293_v5  ;;  %v1397_v8 = vrot.slane %v1277_v2, %v297_v6  ;;  %v1399_v9 = vrot.slane %v280_v4, %v293_v5  ;;  %v1401_v10 = vrot.slane %v280_v4, %v297_v6  ;;  %287 = vst [vmem:[#allocation2 + $0x4] sm:$0xff] %v1409_v12 }
  0x12   : > { %413 = vst [vmem:[#allocation4 + $0x48] sm:$0xf] %v1409_v12  ;;  %v470_v15 = vcombine.low %v1409_v12, %v1409_v12  ;;  %v411_v44 = vcombine.high %v1409_v12, %v1409_v12  ;;  %674 = vst.msk [vmem:[#allocation3] sm:$0xff] %vm673_vm12, %v1322_v1 }
  0x13   : > { %v355_v11 = vcombine.low %v1395_v7, %v1397_v8  ;;  %v299_v13 = vcombine.low %v1399_v9, %v1401_v10  ;;  %v1310_v14 = vld [vmem:[#allocation2 + $0xc] ss:$0 sps:$4 sm:$0xff]   ;;  %675 = vst.msk [vmem:[#allocation3 + $0x20] sm:$0xff] %vm673_vm12, %v1322_v1 }
  0x14   : > { %v486_v19 = vld [vmem:[#allocation2 + $0xc] sm:$0xf]  ;;  %414 = vst [vmem:[#allocation4 + $0x28] sm:$0xf] %v411_v44 }
  0x15   : > { %417 = vrot.lane.b32.xlu1 %v355_v11, %s1323_s11  ;;  %487 = vrot.lane.b32.xlu0 %v355_v11, %s1324_s12  ;;  %v442_v25 = vld [vmem:[#allocation2 + $0xc] sm:$0xf] }
  0x16   : > { %v416_v48 = vld [vmem:[#allocation2 + $0xc] sm:$0xf] }
  0x18   : > { %v1312_v16 = vld [vmem:[#allocation2 + $0x8] ss:$0 sps:$4 sm:$0xff]   ;;  %v1428_v17 = vld [vmem:[#allocation2] sm:$0xff] }
  0x19   : > { %356 = vrot.lane.b32.xlu1 %v355_v11, %s1325_s13  ;;  %443 = vrot.lane.b32.xlu0 %v299_v13, %s1326_s14  ;;  %v345_v24 = vld [vmem:[#allocation2 + $0x8] sm:$0xf] }
  0x1a   : > { %v289_v33 = vld [vmem:[#allocation2 + $0x8] sm:$0xf] }
  0x1b   : > { %v382_v51 = vld [vmem:[#allocation2 + $0x8] sm:$0xf] }
  0x1d   : > { %300 = vrot.lane.b32.xlu1 %v299_v13, %s1327_s15  ;;  %383 = vrot.lane.b32.xlu0 %v299_v13, %s1328_s16  ;;  %v633_v13 = vld [vmem:[%s1774_s3] sm:$0xff] }
  0x21   : > { %476 = vrot.lane.b32.xlu0 %v1310_v14, %s1329_s17  ;;  %474 = vrot.lane.b32.xlu1 %v1409_v12, %s1329_s17  ;;  %v634_v14 = vld [vmem:[%s1774_s3 + $0x8] sm:$0xff] }
  0x25   : > { %472 = vrot.lane.b32.xlu0 %v470_v15, %s1329_s17  ;;  %335 = vrot.lane.b32.xlu1 %v1312_v16, %s1330_s18  ;;  %v1331_v15 = vmov 0   ;;  %v1503_v16 = vld [vmem:[#allocation3 + $0x18] sm:$0xff] }
  0x26   : > { %1309 = vset.pattern.permute.xlu1 %v1331_v15  ;;  %1308 = vset.pattern.permute.xlu0 %v1331_v15 }
  0x29   : > { %333 = vrot.lane.b32.xlu0 %v1428_v17, %s1330_s18 }
  0x87   : > { %v418_v18 = vpop.permute.xlu1 %417  ;;  %v488_v20 = vpop.permute.xlu0 %487 }
  0x88   : > { %v489_v21 = vrot.slane %v488_v20, 4  ;;  %v419_v39 = vrot.slane %v418_v18, 4 }
  0x8a   : > { %v494_v22 = vmul.f32 %v489_v21, %v486_v19  ;;  %v490_v31 = vsel %vm318_vm1, %v489_v21, %v488_v20  ;;  %v420_v49 = vsel %vm402_vm6, %v419_v39, %v418_v18  ;;  %v424_v56 = vmul.f32 %v419_v39, %v416_v48 }
  0x8b   : > { %v357_v23 = vpop.permute.xlu1 %356  ;;  %v444_v26 = vpop.permute.xlu0 %443  ;;  %v493_v37 = vmul.f32 %v490_v31, %v1409_v12  ;;  %v423_v55 = vmul.f32 %v420_v49, %v1409_v12 }
  0x8c   : > { %v358_v27 = vrot.slane %v357_v23, 4  ;;  %v445_v28 = vrot.slane %v444_v26, 4  ;;  %502 = vrot.lane.b32.xlu1 %v494_v22, %s1327_s15  ;;  %v428_v61 = vcombine.low %v424_v56, %v424_v56 }
  0x8d   : > { %v497_v63 = vcombine.high %v493_v37, %v493_v37  ;;  %v427_v5 = vcombine.low %v423_v55, %v423_v55 }
  0x8e   : > { %v364_v29 = vmul.f32 %v358_v27, %v345_v24  ;;  %v450_v30 = vmul.f32 %v445_v28, %v442_v25  ;;  %v446_v40 = vsel %vm374_vm3, %v445_v28, %v444_v26  ;;  %v360_v50 = vsel %vm359_vm7, %v358_v27, %v357_v23 }
  0x8f   : > { %v301_v32 = vpop.permute.xlu1 %300  ;;  %v384_v34 = vpop.permute.xlu0 %383  ;;  %v449_v46 = vmul.f32 %v446_v40, %v1409_v12  ;;  %v363_v57 = vmul.f32 %v360_v50, %v1428_v17  ;;  %v329_v12 = vcombine.low %v1428_v17, %v1428_v17 }
  0x90   : > { %v302_v35 = vrot.slane %v301_v32, 4  ;;  %v385_v36 = vrot.slane %v384_v34, 4  ;;  %372 = vrot.lane.b32.xlu1 %v364_v29, %s1326_s14  ;;  %458 = vrot.lane.b32.xlu0 %v450_v30, %s1325_s13 }
  0x91   : > { %v453_v0 = vcombine.high %v449_v46, %v449_v46  ;;  %v367_v4 = vcombine.high %v363_v57, %v363_v57 }
  0x92   : > { %v308_v38 = vmul.f32 %v302_v35, %v289_v33  ;;  %v387_v41 = vsel %vm386_vm4, %v385_v36, %v384_v34  ;;  %v391_v58 = vmul.f32 %v385_v36, %v382_v51  ;;  %v304_v2 = vsel %vm303_vm9, %v302_v35, %v301_v32 }
  0x93   : > { %v477_v42 = vpop.permute.xlu0 %476  ;;  %v475_v43 = vpop.permute.xlu1 %474  ;;  %v390_v47 = vmul.f32 %v387_v41, %v1428_v17  ;;  %v307_v3 = vmul.f32 %v1428_v17, %v304_v2  ;;  %v1505_v17 = vld [vmem:[#allocation3 + $0x38] sm:$0xff] }
  0x94   : > { %498 = vrot.lane.b32.xlu0 %v493_v37, %s1327_s15  ;;  %316 = vrot.lane.b32.xlu1 %v308_v38, %s1324_s12  ;;  %v480_v45 = vsel %vm478_vm5, %v475_v43, %v477_v42  ;;  %v395_v62 = vcombine.low %v391_v58, %v391_v58 }
  0x95   : > { %484 = vst [vmem:[#allocation4 + $0x20] sm:$0xf0] %v480_v45  ;;  %v394_v6 = vcombine.low %v390_v47, %v390_v47  ;;  %v311_v11 = vcombine.high %v307_v3, %v307_v3 }
  0x97   : > { %v473_v52 = vpop.permute.xlu0 %472  ;;  %v336_v54 = vpop.permute.xlu1 %335 }
  0x98   : > { %398 = vrot.lane.b32.xlu0 %v390_v47, %s1323_s11  ;;  %454 = vrot.lane.b32.xlu1 %v449_v46, %s1325_s13  ;;  %v479_v53 = vsel %vm478_vm5, %v473_v52, %v475_v43 }
  0x99   : > { %483 = vst [vmem:[#allocation4 + $0x8] sm:$0xf0] %v479_v53 }
  0x9b   : > { %v1453_v59 = vpop.permute.xlu0 %333 }
  0x9c   : > { %368 = vrot.lane.b32.xlu0 %v363_v57, %s1326_s14  ;;  %431 = vrot.lane.b32.xlu1 %v423_v55, %s1328_s16  ;;  %v339_v60 = vsel %vm337_vm8, %v1453_v59, %v336_v54  ;;  %v510_v55 = vld [vmem:[%s1773_s2] sm:$0xff]  ;;  %v511_v57 = vld [vmem:[%s1773_s2 + $0x8] sm:$0xff] }
  0x9d   : > { %343 = vst [vmem:[#allocation4] sm:$0xf0] %v339_v60 }
  0xa0   : > { %433 = vrot.lane.b32.xlu0 %v428_v61, %s1328_s16  ;;  %400 = vrot.lane.b32.xlu1 %v395_v62, %s1323_s11 }
  0xa4   : > { %500 = vrot.lane.b32.xlu0 %v497_v63, %s1327_s15  ;;  %456 = vrot.lane.b32.xlu1 %v453_v0, %s1325_s13 }
  0xa8   : > { %370 = vrot.lane.b32.xlu0 %v367_v4, %s1326_s14  ;;  %429 = vrot.lane.b32.xlu1 %v427_v5, %s1328_s16 }
  0xac   : > { %396 = vrot.lane.b32.xlu1 %v394_v6, %s1323_s11  ;;  %314 = vrot.lane.b32.xlu0 %v311_v11, %s1324_s12  ;;  %v1557_v6 = vld [vmem:[#allocation3] sm:$0xff] }
  0xad   : > { %v1559_v11 = vld [vmem:[#allocation3 + $0x20] sm:$0xff] }
  0xb0   : > { %331 = vrot.lane.b32.xlu1 %v329_v12, %s1330_s18  ;;  %312 = vrot.lane.b32.xlu0 %v307_v3, %s1324_s12 }
  0xb4   : > { %637 = vperm.xlu1 %1309, %v633_v13   ;;  %642 = vperm.xlu0 %1308, %v634_v14  }
  0xb8   : > { %932 = vrot.lane.b32.xlu1 %v1399_v9, %s1326_s14  ;;  %934 = vrot.lane.b32.xlu0 %v1401_v10, %s1326_s14 }
  0xbc   : > { %882 = vrot.lane.b32.xlu1 %v1395_v7, %s1323_s11  ;;  %884 = vrot.lane.b32.xlu0 %v1397_v8, %s1323_s11 }
  0xc0   : > { %824 = vrot.lane.b32.xlu1 %v1399_v9, %s1328_s16  ;;  %826 = vrot.lane.b32.xlu0 %v1401_v10, %s1328_s16 }
  0xc4   : > { %774 = vrot.lane.b32.xlu1 %v1395_v7, %s1325_s13  ;;  %776 = vrot.lane.b32.xlu0 %v1397_v8, %s1325_s13 }
  0xc8   : > { %688 = vrot.lane.b32.xlu1 %v1399_v9, %s1327_s15  ;;  %690 = vrot.lane.b32.xlu0 %v1401_v10, %s1327_s15 }
  0xcc   : > { %1018 = vrot.lane.b32.xlu1 %v1395_v7, %s1324_s12  ;;  %1020 = vrot.lane.b32.xlu0 %v1397_v8, %s1324_s12 }
  0xd0   : > { %992 = vrot.lane.b32.xlu1 %v1503_v16, %s1329_s17  ;;  %998 = vrot.lane.b32.xlu0 %v1505_v17, %s1329_s17 }
  0xfe   : > { %v503_v9 = vpop.permute.xlu1 %502 }
 0x102   : > { %v373_v18 = vpop.permute.xlu1 %372  ;;  %v459_v19 = vpop.permute.xlu0 %458 }
 0x106   : > { %v499_v10 = vpop.permute.xlu0 %498  ;;  %v317_v20 = vpop.permute.xlu1 %316 }
 0x10a   : > { %v399_v21 = vpop.permute.xlu0 %398  ;;  %v455_v7 = vpop.permute.xlu1 %454 }
 0x10e   : > { %v369_v22 = vpop.permute.xlu0 %368  ;;  %v432_v23 = vpop.permute.xlu1 %431 }
 0x112   : > { %v434_v8 = vpop.permute.xlu0 %433  ;;  %v401_v24 = vpop.permute.xlu1 %400 }
 0x113   : > { %v436_v25 = vsel %vm386_vm4, %v432_v23, %v434_v8  ;;  %v404_v26 = vsel %vm402_vm6, %v399_v21, %v401_v24 }
 0x114   : > { %440 = vst [vmem:[#allocation4 + $0x28] sm:$0xf0] %v436_v25  ;;  %408 = vst [vmem:[#allocation4 + $0x10] sm:$0xf0] %v404_v26 }
 0x116   : > { %v501_v27 = vpop.permute.xlu0 %500  ;;  %v457_v28 = vpop.permute.xlu1 %456 }
 0x117   : > { %v504_v29 = vsel %vm303_vm9, %v499_v10, %v501_v27  ;;  %v505_v30 = vsel %vm303_vm9, %v501_v27, %v503_v9  ;;  %v460_v31 = vsel %vm359_vm7, %v455_v7, %v457_v28  ;;  %v461_v32 = vsel %vm359_vm7, %v457_v28, %v459_v19  ;;  %v513_v19 = vld [vmem:[%s1773_s2 + $0x18] sm:$0xff] }
 0x118   : > { %508 = vst [vmem:[#allocation4 + $0x40] sm:$0xf] %v504_v29  ;;  %509 = vst [vmem:[#allocation4 + $0x38] sm:$0xf] %v505_v30 }
 0x119   : > { %464 = vst [vmem:[#allocation4 + $0x8] sm:$0xf] %v460_v31  ;;  %465 = vst [vmem:[#allocation4 + $0x20] sm:$0xf] %v461_v32 }
 0x11a   : > { %v371_v33 = vpop.permute.xlu0 %370  ;;  %v430_v34 = vpop.permute.xlu1 %429 }
 0x11b   : > { %v375_v35 = vsel %vm374_vm3, %v369_v22, %v371_v33  ;;  %v376_v36 = vsel %vm374_vm3, %v371_v33, %v373_v18  ;;  %v435_v37 = vsel %vm386_vm4, %v430_v34, %v432_v23  ;;  %v519_v50 = vld [vmem:[#allocation4 + $0x28] sm:$0xff]  ;;  %v512_v18 = vld [vmem:[%s1773_s2 + $0x10] sm:$0xff] }
 0x11c   : > { %379 = vst [vmem:[#allocation4 + $0x18] sm:$0xf] %v375_v35  ;;  %380 = vst [vmem:[#allocation4 + $0x10] sm:$0xf] %v376_v36 }
 0x11d   : > { %439 = vst [vmem:[#allocation4 + $0x48] sm:$0xf0] %v435_v37 }
 0x11e   : > { %v397_v38 = vpop.permute.xlu1 %396  ;;  %v315_v39 = vpop.permute.xlu0 %314 }
 0x11f   : > { %v403_v40 = vsel %vm402_vm6, %v397_v38, %v399_v21  ;;  %v320_v41 = vsel %vm318_vm1, %v315_v39, %v317_v20  ;;  %v523_v42 = vld [vmem:[#allocation4 + $0x38] sm:$0xf]  ;;  %v522_v43 = vld [vmem:[#allocation4 + $0x40] sm:$0xf] }
 0x120   : > { %407 = vst [vmem:[#allocation4 + $0x18] sm:$0xf0] %v403_v40  ;;  %324 = vst [vmem:[#allocation4] sm:$0xf] %v320_v41  ;;  %1278 = vmatprep.subr.msk.mxu0 %vm537_vm10, %v523_v42  ;;  %v521_v44 = vld [vmem:[#allocation4 + $0x20] sm:$0xff]  ;;  %v520_v47 = vld [vmem:[#allocation4 + $0x8] sm:$0xff] }
 0x121   : > { %1279 = vmatpush1.msk.msra.mxu0 %vm537_vm10, %v522_v43 }
 0x122   : > { %568 = vmatprep.subr.mxu0 %v521_v44  ;;  %v332_v45 = vpop.permute.xlu1 %331  ;;  %v313_v46 = vpop.permute.xlu0 %312 }
 0x123   : > { %v338_v48 = vsel %vm337_vm8, %v332_v45, %v1453_v59  ;;  %v319_v49 = vsel %vm318_vm1, %v313_v46, %v315_v39  ;;  %569 = vmatpush1.msra.mxu0 %v520_v47  ;;  %v517_v52 = vld [vmem:[#allocation4 + $0x10] sm:$0xff] }
 0x124   : > { %v518_v51 = vld [vmem:[#allocation4 + $0x48] sm:$0xff]  ;;  %342 = vst [vmem:[#allocation4 + $0x30] sm:$0xf0] %v338_v48  ;;  %323 = vst [vmem:[#allocation4 + $0x30] sm:$0xf] %v319_v49  ;;  %570 = vmatprep.subr.mxu0 %v519_v50 }
 0x125   : > { %571 = vmatpush1.msra.mxu0 %v518_v51 }
 0x126   : > { %572 = vmatprep.subr.mxu0 %v517_v52 }
 0x127   : > { %v516_v53 = vld [vmem:[#allocation4 + $0x18] sm:$0xff]  ;;  %v515_v54 = vld [vmem:[#allocation4] sm:$0xff] }
 0x128   : > { %573 = vmatpush1.msra.mxu0 %v516_v53 }
 0x129   : > { %574 = vmatprep.subr.mxu0 %v515_v54 }
 0x12b   : > { %v514_v56 = vld [vmem:[#allocation4 + $0x30] sm:$0xff] }
 0x12c   : > { %575 = vmatpush1.msra.mxu0 %v514_v56 }
 0x12d   : > { %1280 = vmatmul.mubr.msk.f32.vlgmr.msra.gmra.mxu0 %vm524_vm11, %v510_v55 }
 0x12e   : > { %614 = vmatprep.mubr.f32.mxu0 %v1322_v1 }
 0x12f   : > { %v643_v58 = vpop.permute.xlu0 %642  ;;  %v638_v2 = vpop.permute.xlu1 %637 }
 0x131   : > { %1281 = vmatmul.mubr.msk.f32.gmra.mxu0 %vm524_vm11, %v511_v57 }
 0x132   : > { %620 = vmatprep.mubr.f32.mxu0 %v1322_v1 }
 0x133   : > { %v1535_v59 = vpop.permute.xlu0 %934  ;;  %v1551_v3 = vpop.permute.xlu1 %932 }
 0x134   : > { %v942_v60 = vmul.f32 %v1503_v16, %v1535_v59  ;;  %v945_v61 = vmul.f32 %v1505_v17, %v1535_v59  ;;  %v936_v43 = vsel %vm374_vm3, %v1551_v3, %v1535_v59 }
 0x135   : > { %1282 = vmatmul.mubr.msk.f32.gmra.mxu0 %vm524_vm11, %v512_v18 }
 0x136   : > { %962 = vrot.lane.b32.xlu0 %v945_v61, %s1325_s13  ;;  %956 = vrot.lane.b32.xlu1 %v942_v60, %s1325_s13 }
 0x137   : > { %v1543_v62 = vpop.permute.xlu0 %884  ;;  %v1553_v4 = vpop.permute.xlu1 %882  ;;  %626 = vmatprep.mubr.f32.mxu0 %v1322_v1 }
 0x138   : > { %v892_v63 = vmul.f32 %v1503_v16, %v1543_v62  ;;  %v895_v0 = vmul.f32 %v1505_v17, %v1543_v62  ;;  %v886_v46 = vsel %vm402_vm6, %v1553_v4, %v1543_v62 }
 0x139   : > { %1283 = vmatmul.mubr.msk.f32.gmra.mxu0 %vm524_vm11, %v513_v19 }
 0x13a   : > { %912 = vrot.lane.b32.xlu0 %v895_v0, %s1328_s16  ;;  %906 = vrot.lane.b32.xlu1 %v892_v63, %s1328_s16 }
 0x13b   : > { %v825_v5 = vpop.permute.xlu1 %824  ;;  %v827_v31 = vpop.permute.xlu0 %826 }
 0x13c   : > { %v832_v12 = vmul.f32 %v825_v5, %v1557_v6  ;;  %v835_v13 = vmul.f32 %v825_v5, %v1559_v11  ;;  %v828_v38 = vsel %vm386_vm4, %v825_v5, %v827_v31 }
 0x13e   : > { %844 = vrot.lane.b32.xlu0 %v832_v12, %s1323_s11  ;;  %850 = vrot.lane.b32.xlu1 %v835_v13, %s1323_s11  ;;  %v1102_v13 = vld [vmem:[%s1777_s6] sm:$0xff] }
 0x13f   : > { %v775_v14 = vpop.permute.xlu1 %774  ;;  %v777_v34 = vpop.permute.xlu0 %776 }
 0x140   : > { %v782_v15 = vmul.f32 %v1557_v6, %v775_v14  ;;  %v785_v9 = vmul.f32 %v1559_v11, %v775_v14  ;;  %v778_v40 = vsel %vm359_vm7, %v775_v14, %v777_v34  ;;  %v1103_v14 = vld [vmem:[%s1777_s6 + $0x8] sm:$0xff] }
 0x142   : > { %794 = vrot.lane.b32.xlu0 %v782_v15, %s1326_s14  ;;  %800 = vrot.lane.b32.xlu1 %v785_v9, %s1326_s14  ;;  %v657_v15 = vld [vmem:[%s1775_s4] sm:$0xff] }
 0x143   : > { %v689_v50 = vpop.permute.xlu1 %688  ;;  %v691_v51 = vpop.permute.xlu0 %690 }
 0x144   : > { %v692_v53 = vsel %vm303_vm9, %v689_v50, %v691_v51  ;;  %v696_v56 = vmul.f32 %v1557_v6, %v689_v50  ;;  %v699_v60 = vmul.f32 %v1559_v11, %v689_v50 }
 0x146   : > { %750 = vrot.lane.b32.xlu1 %v1559_v11, %s1330_s18 }
 0x147   : > { %v1021_v61 = vpop.permute.xlu0 %1020  ;;  %v1019_v0 = vpop.permute.xlu1 %1018 }
 0x148   : > { %v1031_v62 = vmul.f32 %v1021_v61, %v1505_v17  ;;  %v1022_v17 = vsel %vm318_vm1, %v1019_v0, %v1021_v61  ;;  %v1028_v12 = vmul.f32 %v1021_v61, %v1503_v16  ;;  %v658_v16 = vld [vmem:[%s1775_s4 + $0x8] sm:$0xff] }
 0x14b   : > { %v993_v9 = vpop.permute.xlu1 %992  ;;  %v999_v18 = vpop.permute.xlu0 %998 }
 0x1a8   : > { %v957_v19 = vpop.permute.xlu1 %956 }
 0x1ed   : > { %v610_v10 = vpop.f32.mrf.mxu0 }
 0x1ee   : > { %v645_v20 = vadd.f32 %v638_v2, %v610_v10  ;;  %v963_v10 = vpop.permute.xlu0 %962 }
 0x1ef   : > { %v612_v21 = vpop.f32.mrf.mxu0 }
 0x1f0   : > { %v649_v7 = vmul.f32 0.01, %v645_v20  ;;  %v646_v22 = vadd.f32 %v638_v2, %v612_v21  ;;  %v1063_v2 = vld [vmem:[%s1776_s5 + $0x8] sm:$0xff] }
 0x1f1   : > { %v616_v23 = vpop.f32.mrf.mxu0  ;;  %1284 = vmatprep.mubr.msk.f32.mxu1 %vm337_vm8, %v1063_v2 }
 0x1f2   : > { %v1580_v8 = vmax.f32 %v645_v20, %v649_v7  ;;  %v650_v24 = vmul.f32 0.01, %v646_v22  ;;  %v647_v25 = vadd.f32 %v643_v58, %v616_v23  ;;  %v907_v20 = vpop.permute.xlu1 %906  ;;  %v913_v21 = vpop.permute.xlu0 %912 }
 0x1f3   : > { %v618_v26 = vpop.f32.mrf.mxu0 }
 0x1f4   : > { %v1582_v27 = vmax.f32 %v646_v22, %v650_v24  ;;  %v651_v1 = vmul.f32 0.01, %v647_v25  ;;  %v648_v28 = vadd.f32 %v643_v58, %v618_v26  ;;  %988 = vrot.lane.b32.xlu0 %v1580_v8, %s1329_s17  ;;  %v940_v36 = vmul.f32 %v1551_v3, %v1580_v8 }
 0x1f5   : > { %v890_v37 = vmul.f32 %v1553_v4, %v1580_v8  ;;  %v833_v39 = vmul.f32 %v828_v38, %v1580_v8  ;;  %v783_v42 = vmul.f32 %v778_v40, %v1580_v8  ;;  %v697_v55 = vmul.f32 %v692_v53, %v1580_v8 }
 0x1f6   : > { %v1586_v29 = vmax.f32 %v647_v25, %v651_v1  ;;  %v652_v30 = vmul.f32 0.01, %v648_v28  ;;  %v834_v33 = vmul.f32 %v827_v31, %v1582_v27  ;;  %v784_v35 = vmul.f32 %v777_v34, %v1582_v27  ;;  %v1692_v7 = vpop.permute.xlu1 %850  ;;  %v1694_v22 = vpop.permute.xlu0 %844 }
 0x1f7   : > { %v941_v45 = vmul.f32 %v936_v43, %v1582_v27  ;;  %v891_v48 = vmul.f32 %v886_v46, %v1582_v27  ;;  %v698_v63 = vmul.f32 %v691_v51, %v1582_v27  ;;  %v1026_v11 = vmul.f32 %v1019_v0, %v1580_v8 }
 0x1f8   : > { %v1588_v32 = vmax.f32 %v648_v28, %v652_v30  ;;  %746 = vrot.lane.b32.xlu0 %v1580_v8, %s1330_s18  ;;  %994 = vrot.lane.b32.xlu1 %v1586_v29, %s1329_s17  ;;  %v943_v41 = vmul.f32 %v1551_v3, %v1586_v29  ;;  %v893_v44 = vmul.f32 %v1553_v4, %v1586_v29 }
 0x1f9   : > { %v836_v47 = vmul.f32 %v828_v38, %v1586_v29  ;;  %v786_v49 = vmul.f32 %v778_v40, %v1586_v29  ;;  %v700_v57 = vmul.f32 %v692_v53, %v1586_v29  ;;  %v1029_v4 = vmul.f32 %v1019_v0, %v1586_v29 }
 0x1fa   : > { %v944_v52 = vmul.f32 %v936_v43, %v1588_v32  ;;  %v894_v54 = vmul.f32 %v886_v46, %v1588_v32  ;;  %v837_v58 = vmul.f32 %v827_v31, %v1588_v32  ;;  %v787_v59 = vmul.f32 %v777_v34, %v1588_v32  ;;  %v1696_v23 = vpop.permute.xlu1 %800  ;;  %v1698_v24 = vpop.permute.xlu0 %794 }
 0x1fb   : > { %v701_v3 = vmul.f32 %v691_v51, %v1588_v32  ;;  %v1030_v5 = vmul.f32 %v1022_v17, %v1588_v32 }
 0x1fc   : > { %990 = vrot.lane.b32.xlu0 %v1582_v27, %s1329_s17  ;;  %848 = vrot.lane.b32.xlu1 %v834_v33, %s1323_s11 }
 0x1fe   : > { %v1700_v25 = vpop.permute.xlu1 %750 }
 0x200   : > { %952 = vrot.lane.b32.xlu0 %v940_v36, %s1325_s13  ;;  %798 = vrot.lane.b32.xlu1 %v784_v35, %s1326_s14 }
 0x204   : > { %902 = vrot.lane.b32.xlu0 %v890_v37, %s1328_s16  ;;  %752 = vrot.lane.b32.xlu1 %v1586_v29, %s1330_s18 }
 0x208   : > { %846 = vrot.lane.b32.xlu0 %v833_v39, %s1323_s11  ;;  %996 = vrot.lane.b32.xlu1 %v1588_v32, %s1329_s17 }
 0x20c   : > { %958 = vrot.lane.b32.xlu1 %v943_v41, %s1325_s13  ;;  %796 = vrot.lane.b32.xlu0 %v783_v42, %s1326_s14 }
 0x210   : > { %908 = vrot.lane.b32.xlu1 %v893_v44, %s1328_s16  ;;  %954 = vrot.lane.b32.xlu0 %v941_v45, %s1325_s13 }
 0x214   : > { %852 = vrot.lane.b32.xlu1 %v836_v47, %s1323_s11  ;;  %904 = vrot.lane.b32.xlu0 %v891_v48, %s1328_s16 }
 0x218   : > { %802 = vrot.lane.b32.xlu1 %v786_v49, %s1326_s14  ;;  %754 = vrot.lane.b32.xlu0 %v1588_v32, %s1330_s18 }
 0x21c   : > { %960 = vrot.lane.b32.xlu1 %v944_v52, %s1325_s13  ;;  %744 = vrot.lane.b32.xlu0 %v1557_v6, %s1330_s18  ;;  %v1027_v6 = vmul.f32 %v1022_v17, %v1582_v27 }
 0x220   : > { %910 = vrot.lane.b32.xlu1 %v894_v54, %s1328_s16  ;;  %710 = vrot.lane.b32.xlu0 %v697_v55, %s1324_s12 }
 0x224   : > { %748 = vrot.lane.b32.xlu1 %v1582_v27, %s1330_s18  ;;  %708 = vrot.lane.b32.xlu0 %v696_v56, %s1324_s12 }
 0x228   : > { %716 = vrot.lane.b32.xlu1 %v700_v57, %s1324_s12  ;;  %854 = vrot.lane.b32.xlu0 %v837_v58, %s1323_s11 }
 0x22c   : > { %714 = vrot.lane.b32.xlu1 %v699_v60, %s1324_s12  ;;  %804 = vrot.lane.b32.xlu0 %v787_v59, %s1326_s14 }
 0x230   : > { %712 = vrot.lane.b32.xlu1 %v698_v63, %s1324_s12  ;;  %1048 = vrot.lane.b32.xlu0 %v1031_v62, %s1327_s15 }
 0x234   : > { %1044 = vrot.lane.b32.xlu1 %v1029_v4, %s1327_s15  ;;  %718 = vrot.lane.b32.xlu0 %v701_v3, %s1324_s12 }
 0x238   : > { %1046 = vrot.lane.b32.xlu1 %v1030_v5, %s1327_s15  ;;  %1040 = vrot.lane.b32.xlu0 %v1027_v6, %s1327_s15 }
 0x23c   : > { %1042 = vrot.lane.b32.xlu1 %v1028_v12, %s1327_s15  ;;  %1038 = vrot.lane.b32.xlu0 %v1026_v11, %s1327_s15 }
 0x240   : > { %1106 = vperm.xlu1 %1309, %v1102_v13   ;;  %1111 = vperm.xlu0 %1308, %v1103_v14  }
 0x244   : > { %661 = vperm.xlu1 %1309, %v657_v15   ;;  %666 = vperm.xlu0 %1308, %v658_v16  }
 0x266   : > { %v989_v26 = vpop.permute.xlu0 %988 }
 0x26a   : > { %v995_v1 = vpop.permute.xlu1 %994  ;;  %v1702_v28 = vpop.permute.xlu0 %746 }
 0x26e   : > { %v849_v30 = vpop.permute.xlu1 %848  ;;  %v991_v31 = vpop.permute.xlu0 %990 }
 0x26f   : > { %v1001_v41 = vsel %vm478_vm5, %v991_v31, %v993_v9  ;;  %v1000_v44 = vsel %vm478_vm5, %v989_v26, %v991_v31 }
 0x272   : > { %v1704_v33 = vpop.permute.xlu1 %798  ;;  %v953_v34 = vpop.permute.xlu0 %952 }
 0x276   : > { %v1706_v35 = vpop.permute.xlu1 %752  ;;  %v903_v36 = vpop.permute.xlu0 %902 }
 0x277   : > { %v758_v16 = vsel %vm337_vm8, %v1700_v25, %v1706_v35 }
 0x27a   : > { %v997_v37 = vpop.permute.xlu1 %996  ;;  %v847_v38 = vpop.permute.xlu0 %846 }
 0x27b   : > { %v1003_v39 = vsel %vm478_vm5, %v997_v37, %v999_v18  ;;  %v1002_v40 = vsel %vm478_vm5, %v995_v1, %v997_v37  ;;  %v857_v5 = vsel %vm402_vm6, %v847_v38, %v849_v30 }
 0x27c   : > { %1120 = vmatprep.subr.mxu1 %v1003_v39 }
 0x27d   : > { %1121 = vmatpush1.msra.mxu1 %v1002_v40 }
 0x27e   : > { %v959_v42 = vpop.permute.xlu1 %958  ;;  %1122 = vmatprep.subr.mxu1 %v1001_v41  ;;  %v797_v43 = vpop.permute.xlu0 %796 }
 0x27f   : > { %1123 = vmatpush1.msra.mxu1 %v1000_v44  ;;  %v807_v11 = vsel %vm374_vm3, %v797_v43, %v1704_v33  ;;  %v806_v14 = vsel %vm374_vm3, %v1698_v24, %v797_v43  ;;  %v1062_v33 = vld [vmem:[%s1776_s5] sm:$0xff] }
 0x282   : > { %v909_v45 = vpop.permute.xlu1 %908  ;;  %v955_v46 = vpop.permute.xlu0 %954 }
 0x283   : > { %v965_v55 = vsel %vm359_vm7, %v955_v46, %v957_v19  ;;  %v964_v58 = vsel %vm359_vm7, %v953_v34, %v955_v46  ;;  %v1065_v34 = vld [vmem:[%s1776_s5 + $0x18] sm:$0xff] }
 0x286   : > { %v853_v47 = vpop.permute.xlu1 %852  ;;  %v905_v48 = vpop.permute.xlu0 %904 }
 0x287   : > { %v915_v61 = vsel %vm386_vm4, %v905_v48, %v907_v20  ;;  %v914_v0 = vsel %vm386_vm4, %v903_v36, %v905_v48  ;;  %v858_v17 = vsel %vm402_vm6, %v1692_v7, %v853_v47  ;;  %v622_v36 = vpop.f32.mrf.mxu0 }
 0x28a   : > { %v803_v49 = vpop.permute.xlu1 %802  ;;  %v755_v50 = vpop.permute.xlu0 %754 }
 0x28b   : > { %v759_v15 = vsel %vm337_vm8, %v1706_v35, %v755_v50  ;;  %v1064_v35 = vld [vmem:[%s1776_s5 + $0x10] sm:$0xff] }
 0x28e   : > { %v961_v51 = vpop.permute.xlu1 %960  ;;  %v745_v52 = vpop.permute.xlu0 %744 }
 0x28f   : > { %v967_v53 = vsel %vm359_vm7, %v961_v51, %v963_v10  ;;  %v966_v54 = vsel %vm359_vm7, %v959_v42, %v961_v51  ;;  %v756_v10 = vsel %vm337_vm8, %v745_v52, %v1702_v28 }
 0x290   : > { %1124 = vmatprep.subr.mxu1 %v967_v53 }
 0x291   : > { %1125 = vmatpush1.msra.mxu1 %v966_v54 }
 0x292   : > { %v911_v56 = vpop.permute.xlu1 %910  ;;  %1126 = vmatprep.subr.mxu1 %v965_v55  ;;  %v711_v57 = vpop.permute.xlu0 %710 }
 0x293   : > { %1127 = vmatpush1.msra.mxu1 %v964_v58  ;;  %v917_v59 = vsel %vm386_vm4, %v911_v56, %v913_v21  ;;  %v916_v60 = vsel %vm386_vm4, %v909_v45, %v911_v56 }
 0x294   : > { %1128 = vmatprep.subr.mxu1 %v917_v59 }
 0x295   : > { %1129 = vmatpush1.msra.mxu1 %v916_v60 }
 0x296   : > { %v749_v62 = vpop.permute.xlu1 %748  ;;  %1130 = vmatprep.subr.mxu1 %v915_v61  ;;  %v709_v63 = vpop.permute.xlu0 %708 }
 0x297   : > { %1131 = vmatpush1.msra.mxu1 %v914_v0  ;;  %v757_v9 = vsel %vm337_vm8, %v1702_v28, %v749_v62  ;;  %v720_v24 = vsel %vm318_vm1, %v709_v63, %v711_v57 }
 0x298   : > { %1132 = vmatprep.subr.mxu1 %v1588_v32 }
 0x299   : > { %1133 = vmatpush1.msra.mxu1 %v1586_v29  ;;  %v856_v29 = vsel %vm402_vm6, %v1694_v22, %v847_v38  ;;  %v624_v38 = vpop.f32.mrf.mxu0 }
 0x29a   : > { %v717_v2 = vpop.permute.xlu1 %716  ;;  %1134 = vmatprep.subr.mxu1 %v1582_v27  ;;  %v855_v3 = vpop.permute.xlu0 %854 }
 0x29b   : > { %1135 = vmatpush1.msra.mxu1 %v1580_v8  ;;  %v859_v4 = vsel %vm402_vm6, %v853_v47, %v855_v3  ;;  %v808_v8 = vsel %vm374_vm3, %v1696_v23, %v803_v49  ;;  %v628_v46 = vpop.f32.mrf.mxu0 }
 0x29c   : > { %1136 = vmatprep.subr.mxu1 %v859_v4 }
 0x29d   : > { %1137 = vmatpush1.msra.mxu1 %v858_v17  ;;  %v630_v59 = vpop.f32.mrf.mxu0 }
 0x29e   : > { %v715_v6 = vpop.permute.xlu1 %714  ;;  %1138 = vmatprep.subr.mxu1 %v857_v5  ;;  %v805_v32 = vpop.permute.xlu0 %804 }
 0x29f   : > { %1139 = vmatpush1.msra.mxu1 %v856_v29  ;;  %v809_v27 = vsel %vm374_vm3, %v803_v49, %v805_v32  ;;  %v722_v21 = vsel %vm318_vm1, %v715_v6, %v717_v2 }
 0x2a0   : > { %1140 = vmatprep.subr.mxu1 %v809_v27 }
 0x2a1   : > { %1141 = vmatpush1.msra.mxu1 %v808_v8 }
 0x2a2   : > { %v713_v12 = vpop.permute.xlu1 %712  ;;  %1142 = vmatprep.subr.mxu1 %v807_v11  ;;  %v1049_v13 = vpop.permute.xlu0 %1048 }
 0x2a3   : > { %1143 = vmatpush1.msra.mxu1 %v806_v14  ;;  %v721_v7 = vsel %vm318_vm1, %v711_v57, %v713_v12 }
 0x2a4   : > { %1144 = vmatprep.subr.mxu1 %v759_v15 }
 0x2a5   : > { %1145 = vmatpush1.msra.mxu1 %v758_v16 }
 0x2a6   : > { %v1045_v18 = vpop.permute.xlu1 %1044  ;;  %1146 = vmatprep.subr.mxu1 %v757_v9  ;;  %v719_v19 = vpop.permute.xlu0 %718 }
 0x2a7   : > { %1147 = vmatpush1.msra.mxu1 %v756_v10  ;;  %v723_v20 = vsel %vm318_vm1, %v717_v2, %v719_v19 }
 0x2a8   : > { %1148 = vmatprep.subr.mxu1 %v723_v20 }
 0x2a9   : > { %1149 = vmatpush1.msra.mxu1 %v722_v21 }
 0x2aa   : > { %v1047_v22 = vpop.permute.xlu1 %1046  ;;  %1150 = vmatprep.subr.mxu1 %v721_v7  ;;  %v1041_v23 = vpop.permute.xlu0 %1040 }
 0x2ab   : > { %1151 = vmatpush1.msra.mxu1 %v720_v24  ;;  %v1053_v25 = vsel %vm303_vm9, %v1047_v22, %v1049_v13  ;;  %v1052_v26 = vsel %vm303_vm9, %v1045_v18, %v1047_v22 }
 0x2ac   : > { %1180 = vmatprep.subr.mxu1 %v1053_v25 }
 0x2ad   : > { %1181 = vmatpush2.msra.mxu1 %v1052_v26 }
 0x2ae   : > { %v1043_v1 = vpop.permute.xlu1 %1042  ;;  %v1039_v28 = vpop.permute.xlu0 %1038 }
 0x2af   : > { %v1051_v30 = vsel %vm303_vm9, %v1041_v23, %v1043_v1  ;;  %v1050_v31 = vsel %vm303_vm9, %v1039_v28, %v1041_v23 }
 0x2b0   : > { %1182 = vmatprep.subr.mxu1 %v1051_v30 }
 0x2b1   : > { %1183 = vmatpush2.msra.mxu1 %v1050_v31 }
 0x2b2   : > { %1185 = vmatmul.mubr.f32.vlgmr.msra.gmra.mxu1 %v1062_v33 }
 0x2b3   : > { %1285 = vmatprep.mubr.msk.f32.mxu1 %vm337_vm8, %v1065_v34 }
 0x2b6   : > { %1191 = vmatmul.mubr.f32.gmra.mxu1 %v1064_v35 }
 0x2bb   : > { %v1107_v37 = vpop.permute.xlu1 %1106  ;;  %v1112_v39 = vpop.permute.xlu0 %1111 }
 0x2bf   : > { %v662_v42 = vpop.permute.xlu1 %661  ;;  %v667_v53 = vpop.permute.xlu0 %666 }
 0x2c0   : > { %v669_v48 = vadd.f32 %v662_v42, %v622_v36  ;;  %v670_v52 = vadd.f32 %v662_v42, %v624_v38  ;;  %v671_v60 = vadd.f32 %v667_v53, %v628_v46  ;;  %v672_v0 = vadd.f32 %v667_v53, %v630_v59 }
 0x372   : > { %v1186_v40 = vpop.f32.mrf.mxu1 }
 0x373   : > { %v1187_v41 = vadd.f32 %v1186_v40, %v1107_v37 }
 0x374   : > { %v1188_v43 = vpop.f32.mrf.mxu1 }
 0x375   : > { %v1197_v44 = vmul.f32 0.01, %v1187_v41  ;;  %v1189_v45 = vadd.f32 %v1188_v43, %v1107_v37 }
 0x376   : > { %v1192_v47 = vpop.f32.mrf.mxu1 }
 0x377   : > { %v1201_v49 = vmax.f32 %v1187_v41, %v1197_v44  ;;  %v1198_v50 = vmul.f32 0.01, %v1189_v45  ;;  %v1193_v51 = vadd.f32 %v1192_v47, %v1112_v39 }
 0x378   : > { %v1194_v54 = vpop.f32.mrf.mxu1 }
 0x379   : > { %v1205_v55 = vadd.f32 %v1201_v49, %v669_v48  ;;  %v1202_v56 = vmax.f32 %v1189_v45, %v1198_v50  ;;  %v1199_v57 = vmul.f32 0.01, %v1193_v51  ;;  %v1195_v58 = vadd.f32 %v1194_v54, %v1112_v39 }
 0x37b   : > { %1209 = vst [vmem:[%s278_s8] sm:$0xff] %v1205_v55  ;;  %v1206_v61 = vadd.f32 %v1202_v56, %v670_v52  ;;  %v1203_v62 = vmax.f32 %v1193_v51, %v1199_v57  ;;  %v1200_v63 = vmul.f32 0.01, %v1195_v58 }
 0x37d   : > { %1210 = vst [vmem:[%s278_s8 + $0x8] sm:$0xff] %v1206_v61  ;;  %v1207_v2 = vadd.f32 %v1203_v62, %v671_v60  ;;  %v1204_v3 = vmax.f32 %v1195_v58, %v1200_v63 }
 0x37f   : > { %1211 = vst [vmem:[%s278_s8 + $0x10] sm:$0xff] %v1207_v2  ;;  %v1208_v4 = vadd.f32 %v1204_v3, %v672_v0 }
 0x381   : > { %1212 = vst [vmem:[%s278_s8 + $0x18] sm:$0xff] %v1208_v4 }
 0x382 PF: > { %s17_s24 = sadd.s32 1, %s1320_s24  }
 0x383   : > { %p14_p4 = scmp.ge.s32.totalorder %s17_s24, 4  }
 0x385   :  { %16 = sbr.rel (!%p14_p4) target bundleno = 1 (0x1), region = 79 }

</bundles_post_ra>
